<compile_context>
chip_gen: v6e
topology: v6e:2x2x1
jax: 0.10.0
libtpu: 0.0.40
codegen_flags: <defaults>
</compile_context>

<pallas_src>
import jax
import jax.numpy as jnp
from jax.experimental import pallas as pl
from jax.experimental.pallas import tpu as pltpu


# ----------------------------------------------------------------------------- helpers
def _round_up(x: int, m: int) -> int:
    return ((x + m - 1) // m) * m


def _row_align(itemsize: int) -> int:
    if itemsize >= 4:
        return 8
    if itemsize == 2:
        return 16
    return 32


def _vmem_budget():
    """Generation-aware (tiling budget, vmem_limit) in bytes."""
    try:
        cap = int(pltpu.get_tpu_info().vmem_capacity_bytes)
    except Exception:
        cap = None
    if not cap or cap <= 0:
        cap = 64 * 1024 * 1024                    # conservative: v7x per-TC VMEM
    budget = min((cap * 5) // 8, 48 * 1024 * 1024)     # tiles + scratch target
    vmem_limit = min((cap * 3) // 4, 96 * 1024 * 1024)
    return budget, vmem_limit


def _input_spec(block_shape, index_map, buffer_count=2):
    """BlockSpec with optional >2-deep input pipelining when this jax supports it."""
    if buffer_count > 2 and hasattr(pl, "Buffered"):
        try:
            return pl.BlockSpec(block_shape, index_map,
                                pipeline_mode=pl.Buffered(buffer_count))
        except Exception:
            pass
    return pl.BlockSpec(block_shape, index_map)


def _block_id(idx_i32, dim: int):
    # floor(idx / dim) via f32 multiply (avoids vector integer division, which
    # Mosaic may not lower).  Exact: the +0.5 offset keeps the true quotient at
    # least 0.5/dim away from an integer, far above f32 rounding error for any
    # realistic D.
    return jnp.floor((idx_i32.astype(jnp.float32) + 0.5) * (1.0 / dim))


def _block_diag_drop_mask(shape, col_off, dim: int, limit: int):
    """drop[i, j] = True where global (row, col) lies in a zeroed diagonal block."""
    row = jax.lax.broadcasted_iota(jnp.int32, shape, 0)
    col = col_off + jax.lax.broadcasted_iota(jnp.int32, shape, 1)
    drop = _block_id(row, dim) == _block_id(col, dim)
    return drop & (row < limit) & (col < limit)


# ----------------------------------------------------------------------------- kernels
def _make_full_gram_kernel(D: int, dim: int, n_clusters: int):
    def kernel(d_ref, out_ref, acc_ref):
        k = pl.program_id(0)

        @pl.when(k == 0)
        def _init():
            acc_ref[...] = jnp.zeros_like(acc_ref)

        d = d_ref[...]                                        # (TN, D), native dtype
        acc_ref[...] += jax.lax.dot_general(                  # contract rows -> (D, D)
            d, d,
            dimension_numbers=(((0,), (0,)), ((), ())),
            preferred_element_type=jnp.float32)

        @pl.when(k == pl.num_programs(0) - 1)
        def _finalize():
            gram = acc_ref[...]
            if n_clusters > 0 and dim > 0:
                drop = _block_diag_drop_mask((D, D), 0, dim, dim * n_clusters)
                masked = jnp.where(drop, 0.0, gram)
            else:
                masked = gram
            ss = jnp.sum(masked * masked, keepdims=True)      # (1, 1)
            out_ref[...] = 0.001 * jnp.sqrt(ss)

    return kernel


def _make_col_tiled_kernel(Dp: int, tdc: int, dim: int, n_clusters: int):
    def kernel(dl_ref, dr_ref, out_ref, acc_ref, ss_ref):
        c = pl.program_id(0)
        r = pl.program_id(1)
        n_c = pl.num_programs(0)
        n_r = pl.num_programs(1)

        @pl.when((c == 0) & (r == 0))
        def _init_ss():
            ss_ref[...] = jnp.zeros_like(ss_ref)

        @pl.when(r == 0)
        def _init_acc():
            acc_ref[...] = jnp.zeros_like(acc_ref)

        acc_ref[...] += jax.lax.dot_general(                  # (Dp, tdc) column slab
            dl_ref[...], dr_ref[...],
            dimension_numbers=(((0,), (0,)), ((), ())),
            preferred_element_type=jnp.float32)

        @pl.when(r == n_r - 1)
        def _slab_done():
            gram = acc_ref[...]
            if n_clusters > 0 and dim > 0:
                drop = _block_diag_drop_mask((Dp, tdc), c * tdc, dim,
                                             dim * n_clusters)
                masked = jnp.where(drop, 0.0, gram)
            else:
                masked = gram
            ss_ref[...] = ss_ref[...] + jnp.sum(masked * masked, keepdims=True)

        @pl.when((r == n_r - 1) & (c == n_c - 1))
        def _write_out():
            out_ref[...] = 0.001 * jnp.sqrt(ss_ref[...])

    return kernel


# ----------------------------------------------------------------------------- runners
def _full_gram_loss(d, dim, n_clusters, budget, vmem_limit, force_tn=None):
    N, D = d.shape
    itemsize = jnp.dtype(d.dtype).itemsize
    row_align = _row_align(itemsize)

    bufs = 3 if D <= 512 else 2                  # deeper pipelining pays off at small D
    acc_bytes = D * D * 4
    per_row = bufs * D * itemsize
    avail = max(0, budget - acc_bytes)
    n_aligned = _round_up(max(N, 1), row_align)

    tn = min(avail // per_row, 8192, n_aligned)
    if tn < n_aligned:
        # Multi-step: prefer multiples of 256 (full-depth MXU passes) and rebalance
        # to minimize zero-row padding waste.
        tn = (tn // 256) * 256 if tn >= 256 else max(row_align,
                                                     (tn // row_align) * row_align)
        steps = -(-N // tn)
        balanced = _round_up(-(-N // steps), 256 if tn >= 256 else row_align)
        tn = min(tn, max(row_align, balanced))
    else:
        tn = n_aligned                           # one grid step covers all rows
    if force_tn is not None:
        tn = max(row_align, _round_up(force_tn, row_align))

    n_padded = _round_up(N, tn)
    if n_padded != N:                            # zero rows do not change d^T d
        d = jnp.pad(d, ((0, n_padded - N), (0, 0)))
    grid = (n_padded // tn,)

    buffer_count = 3 if (bufs == 3 and grid[0] >= 4
                         and tn * D * itemsize <= 2 * 1024 * 1024) else 2

    out = pl.pallas_call(
        _make_full_gram_kernel(D, dim, n_clusters),
        out_shape=jax.ShapeDtypeStruct((1, 1), jnp.float32),
        grid_spec=pltpu.PrefetchScalarGridSpec(
            num_scalar_prefetch=0,
            grid=grid,
            in_specs=[_input_spec((tn, D), lambda k: (k, 0), buffer_count)],
            out_specs=pl.BlockSpec((1, 1), lambda k: (0, 0)),
            scratch_shapes=[pltpu.VMEM((D, D), jnp.float32)]),
        compiler_params=pltpu.CompilerParams(
            dimension_semantics=("arbitrary",),          # row axis is a reduction
            vmem_limit_bytes=vmem_limit),
        cost_estimate=pl.CostEstimate(
            flops=2 * n_padded * D * D,
            transcendentals=1,
            bytes_accessed=n_padded * D * itemsize + 4),
    )(d)
    return out[0, 0]


def _col_tiled_loss(d, dim, n_clusters, budget, vmem_limit,
                    force_tn=None, force_tdc=None):
    N, D = d.shape
    itemsize = jnp.dtype(d.dtype).itemsize
    row_align = _row_align(itemsize)

    if force_tdc is not None:
        tdc = max(128, _round_up(force_tdc, 128))
    else:
        tdc = 128
        for cand in (2048, 1024, 512, 256, 128):
            dp = _round_up(D, cand)
            if dp * cand * 4 + 256 * 2 * (dp + cand) * itemsize <= budget:
                tdc = cand
                break
    Dp = _round_up(D, tdc)
    acc_bytes = Dp * tdc * 4
    per_row = 2 * (Dp + tdc) * itemsize
    avail = max(0, budget - acc_bytes)
    n_aligned = _round_up(max(N, 1), row_align)

    tn = min(max(avail // per_row, row_align), 2048, n_aligned)
    if tn < n_aligned:
        tn = (tn // 256) * 256 if tn >= 256 else max(row_align,
                                                     (tn // row_align) * row_align)
    if force_tn is not None:
        tn = max(row_align, _round_up(force_tn, row_align))

    n_padded = _round_up(N, tn)
    pad_r, pad_c = n_padded - N, Dp - D
    if pad_r or pad_c:                            # zero rows/cols contribute nothing
        d = jnp.pad(d, ((0, pad_r), (0, pad_c)))
    grid = (Dp // tdc, n_padded // tn)            # column slabs outer, rows inner

    out = pl.pallas_call(
        _make_col_tiled_kernel(Dp, tdc, dim, n_clusters),
        out_shape=jax.ShapeDtypeStruct((1, 1), jnp.float32),
        grid_spec=pltpu.PrefetchScalarGridSpec(
            num_scalar_prefetch=0,
            grid=grid,
            in_specs=[pl.BlockSpec((tn, Dp), lambda c, r: (r, 0)),
                      pl.BlockSpec((tn, tdc), lambda c, r: (r, c))],
            out_specs=pl.BlockSpec((1, 1), lambda c, r: (0, 0)),
            scratch_shapes=[pltpu.VMEM((Dp, tdc), jnp.float32),
                            pltpu.VMEM((1, 1), jnp.float32)]),
        compiler_params=pltpu.CompilerParams(
            dimension_semantics=("arbitrary", "arbitrary"),
            vmem_limit_bytes=vmem_limit),
        cost_estimate=pl.CostEstimate(
            flops=2 * n_padded * Dp * Dp,
            transcendentals=1,
            bytes_accessed=n_padded * Dp * itemsize * (Dp // tdc + 1) + 4),
    )(d, d)
    return out[0, 0]


# ----------------------------------------------------------------------------- wrapper
def d_constraint2(d, dim, n_clusters, *, _force_row_tile=None, _force_col_tile=None):
    """Pallas TPU implementation of D_constraint2().forward(d, dim, n_clusters).

    bf16 `d` is the fast (HBM-bound) path: half the streamed bytes and full-rate
    MXU, with f32 accumulation.  `_force_*` are test-only tiling overrides.
    """
    if d.ndim != 2:
        raise ValueError(f"d must be rank-2 (N, D); got shape {d.shape}")
    N, D = d.shape
    if n_clusters > 0 and dim > 0 and dim * n_clusters > D:
        # The PyTorch module's S[i*dim:(i+1)*dim, ...] = zeros(dim, dim) would fail.
        raise ValueError("dim * n_clusters must not exceed d.shape[1]")

    budget, vmem_limit = _vmem_budget()
    if _force_col_tile is not None:
        return _col_tiled_loss(d, dim, n_clusters, budget, vmem_limit,
                               force_tn=_force_row_tile, force_tdc=_force_col_tile)

    itemsize = jnp.dtype(d.dtype).itemsize
    bufs = 3 if D <= 512 else 2
    per_row = bufs * D * itemsize
    n_aligned = _round_up(max(N, 1), _row_align(itemsize))
    acc_bytes = D * D * 4
    full_gram_fits = (acc_bytes + 256 * per_row <= budget or
                      acc_bytes + n_aligned * per_row <= budget)
    if full_gram_fits:
        return _full_gram_loss(d, dim, n_clusters, budget, vmem_limit,
                               force_tn=_force_row_tile)
    return _col_tiled_loss(d, dim, n_clusters, budget, vmem_limit,
                           force_tn=_force_row_tile)


# ----------------------------------------------------------------------------- reference
def _reference(d, dim, n_clusters):
    """Plain-JAX reference mirroring the PyTorch module (f32 math, exact matmul)."""
    D = d.shape[1]
    S = jnp.ones((D, D), jnp.float32)
    for i in range(n_clusters):
        S = S.at[i * dim:(i + 1) * dim, i * dim:(i + 1) * dim].set(0.0)
    df = d.astype(jnp.float32)
    g = jnp.matmul(df.T, df, precision=jax.lax.Precision.HIGHEST)
    return 0.001 * jnp.sqrt(jnp.sum((g * S) ** 2))


if __name__ == "__main__":
    k0, k1, k2 = jax.random.split(jax.random.PRNGKey(0), 3)
    # f32 tolerance absorbs MXU f32 pass-count / XLA matmul precision-default
    # differences; any structural (masking/tiling) bug would be orders larger.
    F32_TOL = dict(rtol=1e-2, atol=1e-4)

    # 1) Module-scale case: dim=4, n_clusters=4 -> D=16, N=8 rows, f32.
    dim, n_clusters = 4, 4
    D = dim * n_clusters
    d = jax.random.normal(k0, (8, D), dtype=jnp.float32)
    out = jax.block_until_ready(d_constraint2(d, dim, n_clusters))
    ref = jax.block_until_ready(_reference(d, dim, n_clusters))
    assert jnp.allclose(out, ref, **F32_TOL), (out, ref)

    # 2) bf16 streaming fast path (f32 accumulation on the MXU).
    d_bf16 = d.astype(jnp.bfloat16)
    out_bf = jax.block_until_ready(d_constraint2(d_bf16, dim, n_clusters))
    ref_bf = jax.block_until_ready(_reference(d_bf16, dim, n_clusters))
    assert jnp.allclose(out_bf, ref_bf, rtol=2e-2, atol=1e-3), (out_bf, ref_bf)

    # 3) Multi-step row pipeline (exercises deeper input pipelining when available).
    d3 = jax.random.normal(k1, (64, 64), dtype=jnp.float32)
    out3 = jax.block_until_ready(d_constraint2(d3, 16, 4, _force_row_tile=16))
    ref3 = jax.block_until_ready(_reference(d3, 16, 4))
    assert jnp.allclose(out3, ref3, **F32_TOL), (out3, ref3)

    # 4) Column-tiled large-D variant, forced to small tiles so it runs at test size.
    d4 = jax.random.normal(k2, (80, 256), dtype=jnp.float32)
    out4 = jax.block_until_ready(
        d_constraint2(d4, 32, 8, _force_row_tile=32, _force_col_tile=128))
    ref4 = jax.block_until_ready(_reference(d4, 32, 8))
    assert jnp.allclose(out4, ref4, **F32_TOL), (out4, ref4)

    print("KERNEL_OK")
</pallas_src>

<mosaic_0001>
module attributes {stable_mosaic.version = 11 : i64} {
  func.func @kernel(%arg0: i32, %arg1: memref<8x16xf32, #tpu.memory_space<vmem>>, %arg2: memref<1x1xf32, #tpu.memory_space<vmem>>, %arg3: memref<16x16xf32, #tpu.memory_space<vmem>>) attributes {dimension_semantics = [#tpu.dimension_semantics<arbitrary>], iteration_bounds = array<i64: 1>, scalar_prefetch = 0 : i64, scratch_operands = 1 : i64, tpu.core_type = #tpu.core_type<tc>, window_params = [{transform_indices = @transform_0, window_bounds = array<i64: 8, 16>}, {pipeline_mode = #tpu.pipeline_mode<synchronous>, transform_indices = @transform_1, window_bounds = array<i64: 1, 1>}]} {
    %c0_i32 = arith.constant 0 : i32
    %0 = arith.cmpi eq, %arg0, %c0_i32 : i32
    %1 = arith.extui %0 : i1 to i32
    %c0_i32_0 = arith.constant 0 : i32
    %2 = arith.cmpi ne, %1, %c0_i32_0 : i32
    scf.if %2 {
      %cst_8 = arith.constant 0.000000e+00 : f32
      %11 = vector.broadcast %cst_8 : f32 to vector<16x16xf32>
      %c0_9 = arith.constant 0 : index
      %c0_10 = arith.constant 0 : index
      %12 = vector.load %arg3[%c0_9, %c0_10] : memref<16x16xf32, #tpu.memory_space<vmem>>, vector<16x16xf32>
      tpu.vector_store %arg3[%c0_9, %c0_10], %11 {strides = array<i32>} : memref<16x16xf32, #tpu.memory_space<vmem>>, vector<16x16xf32>,
    } else {
    }
    %c0 = arith.constant 0 : index
    %c0_1 = arith.constant 0 : index
    %3 = vector.load %arg1[%c0, %c0_1] : memref<8x16xf32, #tpu.memory_space<vmem>>, vector<8x16xf32>
    %c0_2 = arith.constant 0 : index
    %c0_3 = arith.constant 0 : index
    %4 = vector.load %arg3[%c0_2, %c0_3] : memref<16x16xf32, #tpu.memory_space<vmem>>, vector<16x16xf32>
    %cst = arith.constant dense<0.000000e+00> : vector<16x16xf32>
    %5 = tpu.matmul %3, %3, %cst {dimension_numbers = #tpu.dot_dimension_numbers<[0], [0], [1], [1], [0, 1, 1, 1], [], []>} : vector<8x16xf32>, vector<8x16xf32>, vector<16x16xf32> -> vector<16x16xf32>
    %6 = arith.addf %4, %5 : vector<16x16xf32>
    %c0_4 = arith.constant 0 : index
    %c0_5 = arith.constant 0 : index
    %7 = vector.load %arg3[%c0_4, %c0_5] : memref<16x16xf32, #tpu.memory_space<vmem>>, vector<16x16xf32>
    tpu.vector_store %arg3[%c0_4, %c0_5], %6 {strides = array<i32>} : memref<16x16xf32, #tpu.memory_space<vmem>>, vector<16x16xf32>,
    %c0_i32_6 = arith.constant 0 : i32
    %8 = arith.cmpi eq, %arg0, %c0_i32_6 : i32
    %9 = arith.extui %8 : i1 to i32
    %c0_i32_7 = arith.constant 0 : i32
    %10 = arith.cmpi ne, %9, %c0_i32_7 : i32
    scf.if %10 {
      %c0_8 = arith.constant 0 : index
      %c0_9 = arith.constant 0 : index
      %11 = vector.load %arg3[%c0_8, %c0_9] : memref<16x16xf32, #tpu.memory_space<vmem>>, vector<16x16xf32>
      %12 = tpu.iota {dimensions = array<i32: 0>} : vector<16x16xi32>
      %13 = tpu.iota {dimensions = array<i32: 1>} : vector<16x16xi32>
      %c0_i32_10 = arith.constant 0 : i32
      %14 = vector.broadcast %c0_i32_10 : i32 to vector<16x16xi32>
      %15 = arith.addi %14, %13 : vector<16x16xi32>
      %16 = arith.sitofp %12 : vector<16x16xi32> to vector<16x16xf32>
      %cst_11 = arith.constant 5.000000e-01 : f32
      %17 = vector.broadcast %cst_11 : f32 to vector<16x16xf32>
      %18 = arith.addf %16, %17 : vector<16x16xf32>
      %cst_12 = arith.constant 2.500000e-01 : f32
      %19 = vector.broadcast %cst_12 : f32 to vector<16x16xf32>
      %20 = arith.mulf %18, %19 : vector<16x16xf32>
      %21 = math.floor %20 : vector<16x16xf32>
      %22 = arith.sitofp %15 : vector<16x16xi32> to vector<16x16xf32>
      %cst_13 = arith.constant 5.000000e-01 : f32
      %23 = vector.broadcast %cst_13 : f32 to vector<16x16xf32>
      %24 = arith.addf %22, %23 : vector<16x16xf32>
      %cst_14 = arith.constant 2.500000e-01 : f32
      %25 = vector.broadcast %cst_14 : f32 to vector<16x16xf32>
      %26 = arith.mulf %24, %25 : vector<16x16xf32>
      %27 = math.floor %26 : vector<16x16xf32>
      %28 = arith.cmpf oeq, %21, %27 : vector<16x16xf32>
      %c16_i32 = arith.constant 16 : i32
      %29 = vector.broadcast %c16_i32 : i32 to vector<16x16xi32>
      %30 = arith.cmpi slt, %12, %29 : vector<16x16xi32>
      %31 = arith.andi %28, %30 : vector<16x16xi1>
      %c16_i32_15 = arith.constant 16 : i32
      %32 = vector.broadcast %c16_i32_15 : i32 to vector<16x16xi32>
      %33 = arith.cmpi slt, %15, %32 : vector<16x16xi32>
      %34 = arith.andi %31, %33 : vector<16x16xi1>
      %cst_16 = arith.constant 0.000000e+00 : f32
      %35 = vector.broadcast %cst_16 : f32 to vector<16x16xf32>
      %36 = arith.select %34, %35, %11 : vector<16x16xi1>, vector<16x16xf32>
      %37 = arith.mulf %36, %36 : vector<16x16xf32>
      %38 = vector.shape_cast %37 : vector<16x16xf32> to vector<1x16x16xf32>
      %cst_17 = arith.constant dense<0.000000e+00> : vector<1xf32>
      %39 = vector.multi_reduction <add>, %38, %cst_17 [1, 2] : vector<1x16x16xf32> to vector<1xf32>
      %40 = vector.shape_cast %39 : vector<1xf32> to vector<1x1x1xf32>
      %41 = vector.extract %40[0, 0, 0] : f32 from vector<1x1x1xf32>
      %42 = vector.broadcast %41 : f32 to vector<1x1xf32>
      %43 = math.sqrt %42 : vector<1x1xf32>
      %cst_18 = arith.constant 1.000000e-03 : f32
      %44 = vector.broadcast %cst_18 : f32 to vector<1x1xf32>
      %45 = arith.mulf %44, %43 : vector<1x1xf32>
      %c0_19 = arith.constant 0 : index
      %c0_20 = arith.constant 0 : index
      %46 = vector.load %arg2[%c0_19, %c0_20] : memref<1x1xf32, #tpu.memory_space<vmem>>, vector<1x1xf32>
      tpu.vector_store %arg2[%c0_19, %c0_20], %45 {strides = array<i32>} : memref<1x1xf32, #tpu.memory_space<vmem>>, vector<1x1xf32>,
    } else {
    }
    return
  }
  func.func @transform_0(%arg0: i32) -> (i32, i32) {
    %c0_i32 = arith.constant 0 : i32
    %c0_i32_0 = arith.constant 0 : i32
    return %arg0, %c0_i32 : i32, i32
  }
  func.func @transform_1(%arg0: i32) -> (i32, i32) {
    %c0_i32 = arith.constant 0 : i32
    %c0_i32_0 = arith.constant 0 : i32
    %c0_i32_1 = arith.constant 0 : i32
    return %c0_i32, %c0_i32_0 : i32, i32
  }
}

</mosaic_0001>

<bundles_post_ra>
// kernel: tpu_custom_call.1
= control target key start
LH: loop header
LB: loop body
LE: loop exit
PB: predicated region body
PF: predicated region fallthrough
CT: control target
= control target key end

     0   :  { %6 = vsyncpa [#allocation4], 0  ;;  %s309_s0 = inlined_call_operand.hbm [shape: f32[8,16], index: 0, kind: input, shape index: {}]   ;;  %s310_s1 = inlined_call_operand.hbm [shape: f32[1,1], index: 1, kind: output, shape index: {}]  }
   0x1   :  { %7 = vsyncpa [#allocation5], 0  ;;  %s284_s6 = smov [#allocation3]  }
   0x2   :  { %s14_s7 = sshll.u32 %s284_s6, 4  ;;  %s15_s7 = int_to_ptr.vmem [resolvable:$true] %s14_s7 }
   0x3   :  { %s248_s8 = scalar_lea.vmem %s15_s7, 128  ;;  %p253_p1 = scmp.lt.s32.totalorder %s15_s7, %s15_s7 }
   0x4   :  { %p249_p0 = scmp.ne.s32.totalorder %s15_s7, %s248_s8  ;;  %p254_p2 = scmp.lt.s32.totalorder %s248_s8, %s248_s8 }
   0x6   :  { %p255_p3 = por %p254_p2, %p253_p1 }
   0x8   :  { %p256_p4 = pnand %p255_p3, %p249_p0 }
   0xa   :  { %259 = shalt.err (!%p256_p4)
}
   0xb   :  { %17 = dma.hbm_to_vmem [thread:$0]  %s309_s0, 128, %s15_s7, [#allocation4]  }
   0xc   :  { %280 = dma.done.wait [#allocation4], 128  }
   0xd   :  { %281 = vsyncadd [#allocation4], 4294967168  ;;  %v28_v0 = vld [vmem:[#allocation3] sm:$0xff]  ;;  %vm25_vm0 = vcmask 130048   ;;  %v285_v1 = vmov 0.0   ;;  %vm63_vm1 = vcmask 64512   ;;  %v155_v4 = vlaneseq }
   0xe   :  { %31 = vxpose.xlu0.b32.start.end [1/1] (short) (narrow) %v28_v0, 16  ;;  %228 = vmatprep.subr.mxu0 %v28_v0  ;;  %27 = vst.msk [vmem:[#allocation2 + $0x8] sm:$0xff] %vm25_vm0, %v285_v1  ;;  %26 = vst.msk [vmem:[#allocation2] sm:$0xff] %vm25_vm0, %v285_v1  ;;  %s286_s11 = smov [#allocation6]   ;;  %vm206_vm9 = vcmask 0  }
   0xf   :  { %229 = vmatpush3.msra.mxu0 %v28_v0  ;;  %v156_v5 = vshrl.u32 %v155_v4, 7  ;;  %v159_v7 = vand.u32 127, %v155_v4  ;;  %s214_s12 = sshll.u32 %s286_s11, 4  ;;  %s215_s12 = int_to_ptr.vmem [resolvable:$true] %s214_s12 }
  0x10   :  { %s260_s13 = scalar_lea.vmem %s215_s12, 16  ;;  %s264_s14 = scalar_lea.vmem %s215_s12, 32 }
  0x11   :  { %v157_v6 = vadd.s32 8, %v156_v5  ;;  %v168_v9 = vcvt.s32.f32 %v159_v7  ;;  %v160_v10 = vcvt.s32.f32 %v156_v5  ;;  %vm178_vm3 = vcmp.lt.s32.totalorder %v159_v7, 16  ;;  %p261_p5 = scmp.ne.s32.totalorder %s215_s12, %s260_s13  ;;  %p265_p6 = scmp.lt.s32.totalorder %s215_s12, %s215_s12 }
  0x12   :  { %p266_p7 = scmp.lt.s32.totalorder %s264_s14, %s260_s13 }
  0x13   :  { %v161_v8 = vcvt.s32.f32 %v157_v6  ;;  %v169_v12 = vadd.f32 0.5, %v168_v9  ;;  %v162_v13 = vadd.f32 0.5, %v160_v10 }
  0x14   :  { %p267_p8 = por %p266_p7, %p265_p6 }
  0x15   :  { %v163_v11 = vadd.f32 0.5, %v161_v8  ;;  %v170_v15 = vmul.f32 0.25, %v169_v12  ;;  %v30_v16 = vld [vmem:[#allocation2 + $0x8] sm:$0xff]  ;;  %v164_v17 = vmul.f32 0.25, %v162_v13  ;;  %v29_v19 = vld [vmem:[#allocation2] sm:$0xff] }
  0x16   :  { %p268_p9 = pnand %p267_p8, %p261_p5 }
  0x17   :  { %v165_v14 = vmul.f32 0.25, %v163_v11  ;;  %v171_v22 = vfloor.f32 %v170_v15  ;;  %v166_v25 = vfloor.f32 %v164_v17 }
  0x19   :  { %v167_v21 = vfloor.f32 %v165_v14  ;;  %vm172_vm4 = vcmp.eq.f32.partialorder %v166_v25, %v171_v22 }
  0x1a   :  { %vm179_vm6 = vmand %vm172_vm4, %vm178_vm3 }
  0x1b   :  { %vm173_vm2 = vcmp.eq.f32.partialorder %v167_v21, %v171_v22 }
  0x1c   :  { %vm180_vm5 = vmand %vm173_vm2, %vm178_vm3 }
  0x8a   :  { %v47_v2 = vpop.trf.xlu0 }
  0x8b   :  { %230 = vmatprep.mubr.msk.f32.mxu0 %vm63_vm1, %v47_v2 }
  0x8e   :  { %v48_v3 = vpop.trf.xlu0 }
  0x8f   :  { %231 = vmatmul.mubr.msk.f32.vlgmr.msra.gmra.mxu0 %vm63_vm1, %v48_v3 }
 0x14f   :  { %v232_v18 = vpop.f32.mrf.mxu0 }
 0x150   :  { %v146_v20 = vadd.f32 %v232_v18, %v30_v16 }
 0x151   :  { %v136_v23 = vpop.f32.mrf.mxu0 }
 0x152   :  { %149 = vst.msk [vmem:[#allocation2 + $0x8] sm:$0xff] %vm25_vm0, %v146_v20  ;;  %v145_v24 = vadd.f32 %v136_v23, %v29_v19 }
 0x154   :  { %148 = vst.msk [vmem:[#allocation2] sm:$0xff] %vm25_vm0, %v145_v24 }
 0x159   :  { %v154_v26 = vld [vmem:[#allocation2 + $0x8] sm:$0xff] }
 0x15a   :  { %v182_v27 = vsel %vm180_vm5, 0.0, %v154_v26 }
 0x15b   :  { %v153_v28 = vld [vmem:[#allocation2] sm:$0xff]  ;;  %v184_v29 = vmul.f32 %v182_v27, %v182_v27 }
 0x15c   :  { %v181_v30 = vsel %vm179_vm6, 0.0, %v153_v28 }
 0x15d   :  { %v183_v31 = vmul.f32 %v181_v30, %v181_v30  ;;  %v186_v33 = vsel %vm25_vm0, %v184_v29, 0.0 }
 0x15f   :  { %v185_v32 = vsel %vm25_vm0, %v183_v31, 0.0 }
 0x160   :  { %v187_v34 = vadd.f32 %v186_v33, %v185_v32 }
 0x162   :  { %188 = vadd.xlane.f32.xlu0 %v187_v34 }
 0x1eb   :  { %v189_v35 = vpop.xlane.xlu0 %188 }
 0x1ec   :  { %v190_v36 = vrot.slane %v189_v35, 4 }
 0x1ee   :  { %v191_v37 = vadd.f32 %v190_v36, %v189_v35 }
 0x1f0   :  { %v192_v38 = vrot.slane %v191_v37, 2 }
 0x1f2   :  { %v193_v39 = vadd.f32 %v192_v38, %v191_v37 }
 0x1f4   :  { %v194_v40 = vrot.slane %v193_v39, 1 }
 0x1f6   :  { %v195_v41 = vadd.f32 %v194_v40, %v193_v39 }
 0x1f8   :  { %233 = vpush %v195_v41 }
 0x229   :  { %s234_s0 = spop %233 }
 0x22a   :  { %v197_v42 = vstv %s234_s0 }
 0x22b   :  { %238 = vrsqrt.f32 %v197_v42  ;;  %vm200_vm7 = vcmp.eq.f32.partialorder %v197_v42, inf  ;;  %v203_v45 = vand.u32 2147483648, %v197_v42  ;;  %vm202_vm8 = vcmp.eq.f32.partialorder %v197_v42, 0.0 }
 0x238   :  { %v239_v43 = vpop.eup %238 }
 0x239   :  { %v199_v44 = vmul.f32 %v239_v43, %v197_v42 }
 0x23b   :  { %v201_v46 = vsel %vm200_vm7, %v197_v42, %v199_v44 }
 0x23c   :  { %v204_v47 = vsel %vm202_vm8, %v203_v45, %v201_v46 }
 0x23d   :  { %v205_v48 = vmul.f32 0.001, %v204_v47 }
 0x23f   :  { %207 = vst.msk [vmem:[#allocation6] sm:$0x1] %vm206_vm9, %v205_v48 }
 0x240   :  { %271 = shalt.err (!%p268_p9)
}
 0x241   :  { %217 = dma.vmem_to_hbm [thread:$0]  %s215_s12, 16, %s310_s1, [#allocation5]  }
 0x242   :  { %282 = dma.done.wait [#allocation5], 16  }
 0x243   :  { %283 = vsyncadd [#allocation5], 4294967280 }
 0x244   :  { %221 = vsyncpa [#allocation4], 1 }
 0x245   :  { %222 = vsyncpa [#allocation5], 1 }

</bundles_post_ra>
